<compile_context>
chip_gen: v7x
topology: tpu7x:2x2x1
jax: 0.10.0
libtpu: 0.0.40
codegen_flags: <defaults>
</compile_context>

<pallas_src>
import jax
import jax.numpy as jnp
from jax.experimental import pallas as pl
from jax.experimental.pallas import tpu as pltpu


def _round_up(x, n):
    return ((x + n - 1) // n) * n


def _sublane_for(dtype):
    itemsize = jnp.dtype(dtype).itemsize
    if itemsize >= 4:
        return 8
    if itemsize == 2:
        return 16
    return 32


def _mix_kernel(m_ref, f1_ref, f2_ref, out_ref):
    # m_ref: (1,) f32 scalar = sigmoid(w), precomputed in wrapper, resident in SMEM.
    m = m_ref[0]
    f1 = f1_ref[...]
    f2 = f2_ref[...]
    # f1*m + f2*(1-m)  ==  f2 + m*(f1 - f2)   (one sub + one scalar-broadcast mul-add)
    out_ref[...] = (f2 + (f1 - f2) * m).astype(out_ref.dtype)


def mix_forward(fea1, fea2, w):
    """AECR_Net Mix forward. fea1/fea2: same-shape arrays (e.g. NCHW); w: (1,) scalar param."""
    assert fea1.shape == fea2.shape
    assert fea1.dtype == fea2.dtype
    orig_shape = fea1.shape
    dtype = fea1.dtype
    itemsize = jnp.dtype(dtype).itemsize
    total = 1
    for d in orig_shape:
        total *= int(d)

    # Hoist the sigmoid out of the kernel (numerically safe f32 form).
    mix_factor = jax.nn.sigmoid(w.astype(jnp.float32)).reshape((1,))

    # Lane width: largest multiple of 128 (capped at 512) dividing `total` -> no padding,
    # reshape is free, and every store stays full-lane / unmasked.
    lane = 0
    for k in (4, 3, 2, 1):
        if total % (128 * k) == 0:
            lane = 128 * k
            break
    if lane == 0:
        # Element count not a multiple of 128: a scalar mix is handled optimally by plain XLA
        # and this avoids any pad/slice HBM round-trips for irregular shapes.
        m = mix_factor[0]
        return (fea2.astype(jnp.float32)
                + (fea1.astype(jnp.float32) - fea2.astype(jnp.float32)) * m).astype(dtype)

    rows = total // lane
    sublane = _sublane_for(dtype)

    # Row-tile selection:
    #  * ~2 MiB per tile (v5e-safe: ~12 MiB live with double-buffered 2 in + 1 out)
    #  * sublane-aligned for the dtype
    #  * at most ceil(rows/2) so the "parallel" grid has >= 2 steps for v7x megacore
    if rows <= sublane:
        tr = rows  # single block; block dim equals the full array dim (allowed)
    else:
        target = max(sublane, _round_up((2 * 1024 * 1024) // (lane * itemsize), sublane))
        half = _round_up(pl.cdiv(rows, 2), sublane)
        tr = min(target, half, (rows // sublane) * sublane)
        tr = max(tr, sublane)
    grid = (pl.cdiv(rows, tr),)

    f1 = fea1.reshape(rows, lane)
    f2 = fea2.reshape(rows, lane)

    out2d = pl.pallas_call(
        _mix_kernel,
        out_shape=jax.ShapeDtypeStruct((rows, lane), dtype),
        grid_spec=pltpu.PrefetchScalarGridSpec(
            num_scalar_prefetch=0,
            grid=grid,
            in_specs=[
                pl.BlockSpec(memory_space=pltpu.MemorySpace.SMEM),   # sigmoid(w) scalar
                pl.BlockSpec((tr, lane), lambda i: (i, 0)),          # fea1 tile
                pl.BlockSpec((tr, lane), lambda i: (i, 0)),          # fea2 tile
            ],
            out_specs=pl.BlockSpec((tr, lane), lambda i: (i, 0)),
        ),
        compiler_params=pltpu.CompilerParams(
            # Tiles are independent -> shard grid across TensorCores on v7x megacore.
            dimension_semantics=("parallel",),
        ),
        cost_estimate=pl.CostEstimate(
            flops=3 * total,
            transcendentals=0,
            bytes_accessed=3 * total * itemsize,
        ),
        # TODO(synk): if the caller can donate fea1's buffer, add input_output_aliases
        # to reuse it for the output and save one full-size HBM allocation.
    )(mix_factor, f1, f2)

    return out2d.reshape(orig_shape)


if __name__ == "__main__":
    key = jax.random.PRNGKey(0)
    k1, k2 = jax.random.split(key)

    # Small NCHW feature maps consistent with the module's usage.
    N, C, H, W = 2, 4, 16, 16
    fea1 = jax.random.normal(k1, (N, C, H, W), dtype=jnp.float32)
    fea2 = jax.random.normal(k2, (N, C, H, W), dtype=jnp.float32)

    # Deterministic parameter init exactly as in the module: w = [-0.8]
    w = jnp.array([-0.8], dtype=jnp.float32)

    out = mix_forward(fea1, fea2, w)
    out = jax.block_until_ready(out)

    # Reference check in plain JAX
    mf = jax.nn.sigmoid(w[0])
    ref = fea1 * mf + fea2 * (1.0 - mf)
    assert out.shape == (N, C, H, W)
    assert jnp.allclose(out, ref, atol=1e-5, rtol=1e-5)

    print("KERNEL_OK")
</pallas_src>

<mosaic_0001>
module attributes {stable_mosaic.version = 11 : i64} {
  func.func @_mix_kernel(%arg0: i32, %arg1: memref<1xf32, #tpu.memory_space<smem>>, %arg2: memref<4x512xf32, #tpu.memory_space<vmem>>, %arg3: memref<4x512xf32, #tpu.memory_space<vmem>>, %arg4: memref<4x512xf32, #tpu.memory_space<vmem>>) attributes {dimension_semantics = [#tpu.dimension_semantics<parallel>], iteration_bounds = array<i64: 1>, scalar_prefetch = 0 : i64, scratch_operands = 0 : i64, tpu.core_type = #tpu.core_type<tc>, window_params = [{transform_indices = @transform_0, window_bounds = array<i64: 1>}, {transform_indices = @transform_1, window_bounds = array<i64: 4, 512>}, {transform_indices = @transform_2, window_bounds = array<i64: 4, 512>}, {transform_indices = @transform_3, window_bounds = array<i64: 4, 512>}]} {
    %c0 = arith.constant 0 : index
    %0 = memref.load %arg1[%c0] : memref<1xf32, #tpu.memory_space<smem>>
    %c0_0 = arith.constant 0 : index
    %c0_1 = arith.constant 0 : index
    %1 = vector.load %arg2[%c0_0, %c0_1] : memref<4x512xf32, #tpu.memory_space<vmem>>, vector<4x512xf32>
    %c0_2 = arith.constant 0 : index
    %c0_3 = arith.constant 0 : index
    %2 = vector.load %arg3[%c0_2, %c0_3] : memref<4x512xf32, #tpu.memory_space<vmem>>, vector<4x512xf32>
    %3 = arith.subf %1, %2 : vector<4x512xf32>
    %4 = vector.broadcast %0 : f32 to vector<4x512xf32>
    %5 = arith.mulf %3, %4 : vector<4x512xf32>
    %6 = arith.addf %2, %5 : vector<4x512xf32>
    %c0_4 = arith.constant 0 : index
    %c0_5 = arith.constant 0 : index
    %7 = vector.load %arg4[%c0_4, %c0_5] : memref<4x512xf32, #tpu.memory_space<vmem>>, vector<4x512xf32>
    tpu.vector_store %arg4[%c0_4, %c0_5], %6 {strides = array<i32>} : memref<4x512xf32, #tpu.memory_space<vmem>>, vector<4x512xf32>,
    return
  }
  func.func @transform_0(%arg0: i32) -> i32 {
    %c0_i32 = arith.constant 0 : i32
    %c0_i32_0 = arith.constant 0 : i32
    return %c0_i32 : i32
  }
  func.func @transform_1(%arg0: i32) -> (i32, i32) {
    %c0_i32 = arith.constant 0 : i32
    %c0_i32_0 = arith.constant 0 : i32
    return %arg0, %c0_i32 : i32, i32
  }
  func.func @transform_2(%arg0: i32) -> (i32, i32) {
    %c0_i32 = arith.constant 0 : i32
    %c0_i32_0 = arith.constant 0 : i32
    return %arg0, %c0_i32 : i32, i32
  }
  func.func @transform_3(%arg0: i32) -> (i32, i32) {
    %c0_i32 = arith.constant 0 : i32
    %c0_i32_0 = arith.constant 0 : i32
    return %arg0, %c0_i32 : i32, i32
  }
}

</mosaic_0001>

<bundles_post_ra>
// kernel: tpu_custom_call.1
= control target key start
LH: loop header
LB: loop body
LE: loop exit
PB: predicated region body
PF: predicated region fallthrough
CT: control target
= control target key end

     0   :  { %9 = vsyncpa [#allocation4], 0  ;;  %s207_s0 = inlined_call_operand.<no memory space> [shape: f32[1], index: 0, kind: input, shape index: {}]   ;;  %s208_s1 = inlined_call_operand.hbm [shape: f32[4,512], index: 1, kind: input, shape index: {}]   ;;  %s209_s2 = inlined_call_operand.hbm [shape: f32[4,512], index: 2, kind: input, shape index: {}]   ;;  %s210_s3 = inlined_call_operand.hbm [shape: f32[4,512], index: 3, kind: output, shape index: {}]  }
   0x1   :  { %10 = vsyncpa [#allocation7], 0 }
   0x2   :  { %11 = vsyncpa [#allocation5], 0  ;;  %s145_s12 = smov [#allocation3]   ;;  %s146_s14 = smov [#allocation6]  }
   0x3   :  { %s20_s13 = sshll.u32 %s145_s12, 4  ;;  %s30_s15 = sshll.u32 %s146_s14, 4  ;;  %s21_s13 = int_to_ptr.vmem [resolvable:$true] %s20_s13  ;;  %s31_s15 = int_to_ptr.vmem [resolvable:$true] %s30_s15 }
   0x4   :  { %s73_s18 = scalar_lea.hbm %s208_s1, 256 }
   0x5   :  { %p74_p0 = scmp.ne.s32.totalorder %s208_s1, %s73_s18  ;;  %p77_p1 = scmp.lt.u32.totalorder %s73_s18, %s208_s1 }
   0x7   :  { %p79_p2 = pnand %p77_p1, %p74_p0 }
   0x9   :  { %82 = shalt.err (!%p79_p2)
}
   0xa   :  { %s83_s23 = scalar_lea.vmem %s21_s13, 256  ;;  %p88_p4 = scmp.lt.s32.totalorder %s21_s13, %s21_s13 }
   0xb   :  { %p84_p3 = scmp.ne.s32.totalorder %s21_s13, %s83_s23  ;;  %p89_p5 = scmp.lt.s32.totalorder %s83_s23, %s83_s23 }
   0xd   :  { %p90_p6 = por %p89_p5, %p88_p4 }
   0xf   :  { %p91_p7 = pnand %p90_p6, %p84_p3 }
  0x11   :  { %94 = shalt.err (!%p91_p7)
}
  0x12   :  { %23 = dma.hbm_to_vmem [thread:$0]  %s208_s1, 256, %s21_s13, [#allocation4]  }
  0x13   :  { %s95_s28 = scalar_lea.hbm %s209_s2, 256 }
  0x14   :  { %p96_p8 = scmp.ne.s32.totalorder %s209_s2, %s95_s28  ;;  %p99_p9 = scmp.lt.u32.totalorder %s95_s28, %s209_s2 }
  0x16   :  { %p101_p10 = pnand %p99_p9, %p96_p8 }
  0x18   :  { %104 = shalt.err (!%p101_p10)
}
  0x19   :  { %s105_s6 = scalar_lea.vmem %s31_s15, 256  ;;  %p110_p12 = scmp.lt.s32.totalorder %s31_s15, %s31_s15 }
  0x1a   :  { %p106_p11 = scmp.ne.s32.totalorder %s31_s15, %s105_s6  ;;  %p111_p13 = scmp.lt.s32.totalorder %s105_s6, %s105_s6 }
  0x1c   :  { %p112_p0 = por %p111_p13, %p110_p12 }
  0x1e   :  { %p113_p1 = pnand %p112_p0, %p106_p11 }
  0x20   :  { %116 = shalt.err (!%p113_p1)
}
  0x21   :  { %33 = dma.hbm_to_vmem [thread:$0]  %s209_s2, 256, %s31_s15, [#allocation7]  }
  0x22   :  { %139 = dma.done.wait [#allocation4], 256  }
  0x23   :  { %140 = vsyncadd [#allocation4], 4294967040 }
  0x24   :  { %141 = dma.done.wait [#allocation7], 256  }
  0x25   :  { %142 = vsyncadd [#allocation7], 4294967040  ;;  %v41_v0 = vld [vmem:[#allocation3] sm:$0xff]  ;;  %v43_v1 = vld [vmem:[#allocation6] sm:$0xff]  ;;  %v47_v2 = vstv %s207_s0  ;;  %s147_s10 = smov [#allocation8]  }
  0x26   :  { %v42_v3 = vld [vmem:[#allocation3 + $0x8] sm:$0xff]  ;;  %v45_v4 = vsub.f32 %v41_v0, %v43_v1  ;;  %v44_v5 = vld [vmem:[#allocation6 + $0x8] sm:$0xff]  ;;  %s60_s11 = sshll.u32 %s147_s10, 4  ;;  %s61_s11 = int_to_ptr.vmem [resolvable:$true] %s60_s11 }
  0x27   :  { %v46_v6 = vsub.f32 %v42_v3, %v44_v5  ;;  %s117_s2 = scalar_lea.vmem %s61_s11, 256  ;;  %p122_p3 = scmp.lt.s32.totalorder %s61_s11, %s61_s11 }
  0x28   :  { %v48_v7 = vmul.f32 %v47_v2, %v45_v4  ;;  %p118_p2 = scmp.ne.s32.totalorder %s61_s11, %s117_s2  ;;  %p123_p4 = scmp.lt.s32.totalorder %s117_s2, %s117_s2 }
  0x29   :  { %v49_v8 = vmul.f32 %v47_v2, %v46_v6 }
  0x2a   :  { %v50_v9 = vadd.f32 %v48_v7, %v43_v1  ;;  %p124_p5 = por %p123_p4, %p122_p3 }
  0x2b   :  { %v51_v10 = vadd.f32 %v49_v8, %v44_v5 }
  0x2c   :  { %52 = vst [vmem:[#allocation8] sm:$0xff] %v50_v9  ;;  %p125_p6 = pnand %p124_p5, %p118_p2 }
  0x2d   :  { %53 = vst [vmem:[#allocation8 + $0x8] sm:$0xff] %v51_v10 }
  0x2e   :  { %128 = shalt.err (!%p125_p6)
}
  0x2f   :  { %s129_s13 = scalar_lea.hbm %s210_s3, 256 }
  0x30   :  { %p130_p7 = scmp.ne.s32.totalorder %s210_s3, %s129_s13  ;;  %p133_p8 = scmp.lt.u32.totalorder %s129_s13, %s210_s3 }
  0x32   :  { %p135_p9 = pnand %p133_p8, %p130_p7 }
  0x34   :  { %138 = shalt.err (!%p135_p9)
}
  0x35   :  { %63 = dma.vmem_to_hbm [thread:$0]  %s61_s11, 256, %s210_s3, [#allocation5]  }
  0x36   :  { %143 = dma.done.wait [#allocation5], 256  }
  0x37   :  { %144 = vsyncadd [#allocation5], 4294967040 }
  0x38   :  { %67 = vsyncpa [#allocation4], 1 }
  0x39   :  { %68 = vsyncpa [#allocation7], 1 }
  0x3a   :  { %69 = vsyncpa [#allocation5], 1 }

</bundles_post_ra>
